<compile_context>
chip_gen: v7x
topology: tpu7x:2x2x1
jax: 0.10.0
libtpu: 0.0.40
codegen_flags: <defaults>
</compile_context>

<pallas_src>
import functools

import jax
import jax.numpy as jnp
import numpy as np
from jax.experimental import pallas as pl
from jax.experimental.pallas import tpu as pltpu


def _round_up(x, k):
    return (x + k - 1) // k * k


# -----------------------------------------------------------------------------
# Kernel 1: relu + pointwise conv (qkv projection).  q is written transposed.
# -----------------------------------------------------------------------------
def _qkv_kernel(x_ref, wq_ref, wk_ref, wv_ref, bq_ref, bk_ref, bv_ref,
                qt_ref, k_ref, v_ref):
    xr = jnp.maximum(x_ref[0], 0.0)                                # (c_pad, TL)
    q = jnp.dot(wq_ref[...], xr, preferred_element_type=jnp.float32) + bq_ref[...]
    k = jnp.dot(wk_ref[...], xr, preferred_element_type=jnp.float32) + bk_ref[...]
    v = jnp.dot(wv_ref[...], xr, preferred_element_type=jnp.float32) + bv_ref[...]
    # One transpose per L element here (outside the O(L^2) attention loop)
    # so the attention score matmul is a plain NN matmul.
    qt_ref[0] = q.T.astype(qt_ref.dtype)                           # (TL, m_pad)
    k_ref[0] = k.astype(k_ref.dtype)                               # (m_pad, TL)
    v_ref[0] = v.astype(v_ref.dtype)                               # (c_pad, TL)


# -----------------------------------------------------------------------------
# Kernel 2: flash-style attention + residual.
#   grid = (batch, j-tiles [parallel], i-tiles [arbitrary, reduction]).
# -----------------------------------------------------------------------------
def _flash_attn_kernel(qt_ref, k_ref, v_ref, x_ref, gamma_ref, out_ref,
                       m_scr, l_scr):
    ii = pl.program_id(2)

    @pl.when(ii == 0)
    def _init():
        m_scr[...] = jnp.full_like(m_scr, -jnp.inf)
        l_scr[...] = jnp.zeros_like(l_scr)
        out_ref[...] = jnp.zeros_like(out_ref)     # resident accumulator

    qt = qt_ref[0]                                 # (Ti, m_pad) bf16, pre-scaled
    k = k_ref[0]                                   # (m_pad, Tj) bf16
    v = v_ref[0]                                   # (c_pad, Ti) bf16

    # s[i, j] = sum_d q[d, i] * k[d, j]   (already includes the 1/sqrt(m))
    s = jnp.dot(qt, k, preferred_element_type=jnp.float32)         # (Ti, Tj) f32

    # Online softmax over i (axis 0), per output column j.
    m_prev = m_scr[...]                                            # (1, Tj)
    m_new = jnp.maximum(m_prev, jnp.max(s, axis=0, keepdims=True))
    alpha = jnp.exp(m_prev - m_new)                                # (1, Tj)
    p = jnp.exp(s - m_new)                                         # (Ti, Tj) f32

    l_scr[...] = alpha * l_scr[...] + jnp.sum(p, axis=0, keepdims=True)
    m_scr[...] = m_new
    # Accumulate o directly into the resident f32 output block.
    out_ref[0] = alpha * out_ref[0] + jnp.dot(
        v, p.astype(v.dtype), preferred_element_type=jnp.float32)  # (c_pad, Tj)

    @pl.when(ii == pl.num_programs(2) - 1)
    def _finalize():
        inv_l = pl.reciprocal(l_scr[...], approx=True)             # EUP slot
        gamma = gamma_ref[0, 0]                                    # SMEM scalar
        out_ref[0] = x_ref[0] + gamma * (out_ref[0] * inv_l)


# -----------------------------------------------------------------------------
# Wrapper
# -----------------------------------------------------------------------------
def attention_layer(x, w, bias, gamma, *, n, m):
    """x: (B, C, H, W) float32, C == n.  w: (2m+n, n), bias: (2m+n,), gamma: (1,)."""
    b, c, h, w_dim = x.shape
    assert c == n
    L = h * w_dim

    # L tile: 256-aligned preferred (v6e/v7x MXU), 128 otherwise (v5e), else whole L.
    if L % 256 == 0:
        tl = 256
    elif L % 128 == 0:
        tl = 128
    else:
        tl = L
    n_l = L // tl

    # Pad channel dims to multiples of 16 so bf16 q/k/v tiles are whole
    # (16, 128) sublane tiles and f32 x/out tiles are whole (8, 128) tiles.
    m_pad = _round_up(m, 16)
    c_pad = _round_up(n, 16)

    f32, bf16 = jnp.float32, jnp.bfloat16

    xf = x.reshape(b, c, L).astype(f32)
    x_pad = jnp.pad(xf, ((0, 0), (0, c_pad - n), (0, 0)))

    # Fold 1/sqrt(m) into the q projection (zero-cost host rescale).
    inv_sqrt_m = np.float32(1.0 / np.sqrt(m))
    wq = w[0:m].astype(f32) * inv_sqrt_m
    wk = w[m:2 * m].astype(f32)
    wv = w[2 * m:].astype(f32)
    bq = bias[0:m].astype(f32) * inv_sqrt_m
    bk = bias[m:2 * m].astype(f32)
    bv = bias[2 * m:].astype(f32)

    def _pad_w(wm, rows):
        return jnp.pad(wm, ((0, rows - wm.shape[0]), (0, c_pad - wm.shape[1])))

    def _pad_b(bv_, rows):
        return jnp.pad(bv_, (0, rows - bv_.shape[0])).reshape(rows, 1)

    wq_p, wk_p, wv_p = _pad_w(wq, m_pad), _pad_w(wk, m_pad), _pad_w(wv, c_pad)
    bq_p, bk_p, bv_p = _pad_b(bq, m_pad), _pad_b(bk, m_pad), _pad_b(bv, c_pad)

    # ---- Kernel 1: projection ----
    qt, kk, vv = pl.pallas_call(
        _qkv_kernel,
        out_shape=(
            jax.ShapeDtypeStruct((b, L, m_pad), bf16),   # q, transposed
            jax.ShapeDtypeStruct((b, m_pad, L), bf16),   # k
            jax.ShapeDtypeStruct((b, c_pad, L), bf16),   # v
        ),
        grid=(b, n_l),
        in_specs=[
            pl.BlockSpec((1, c_pad, tl), lambda bi, li: (bi, 0, li)),
            pl.BlockSpec((m_pad, c_pad), lambda bi, li: (0, 0)),
            pl.BlockSpec((m_pad, c_pad), lambda bi, li: (0, 0)),
            pl.BlockSpec((c_pad, c_pad), lambda bi, li: (0, 0)),
            pl.BlockSpec((m_pad, 1), lambda bi, li: (0, 0)),
            pl.BlockSpec((m_pad, 1), lambda bi, li: (0, 0)),
            pl.BlockSpec((c_pad, 1), lambda bi, li: (0, 0)),
        ],
        out_specs=(
            pl.BlockSpec((1, tl, m_pad), lambda bi, li: (bi, li, 0)),
            pl.BlockSpec((1, m_pad, tl), lambda bi, li: (bi, 0, li)),
            pl.BlockSpec((1, c_pad, tl), lambda bi, li: (bi, 0, li)),
        ),
        compiler_params=pltpu.CompilerParams(
            dimension_semantics=("parallel", "parallel")),
    )(x_pad, wq_p, wk_p, wv_p, bq_p, bk_p, bv_p)

    # ---- Kernel 2: tiled attention + residual ----
    gamma2d = gamma.reshape(1, 1).astype(f32)
    out_pad = pl.pallas_call(
        _flash_attn_kernel,
        out_shape=jax.ShapeDtypeStruct((b, c_pad, L), f32),
        grid=(b, n_l, n_l),                                   # (batch, j, i)
        in_specs=[
            pl.BlockSpec((1, tl, m_pad), lambda bi, ji, ii: (bi, ii, 0)),  # q^T (i)
            pl.BlockSpec((1, m_pad, tl), lambda bi, ji, ii: (bi, 0, ji)),  # k   (j)
            pl.BlockSpec((1, c_pad, tl), lambda bi, ji, ii: (bi, 0, ii)),  # v   (i)
            pl.BlockSpec((1, c_pad, tl), lambda bi, ji, ii: (bi, 0, ji)),  # x   (j)
            pl.BlockSpec(memory_space=pltpu.MemorySpace.SMEM),             # gamma
        ],
        out_specs=pl.BlockSpec((1, c_pad, tl), lambda bi, ji, ii: (bi, 0, ji)),
        scratch_shapes=[
            pltpu.VMEM((1, tl), f32),   # running max  (per column j)
            pltpu.VMEM((1, tl), f32),   # running sum  (per column j)
        ],
        compiler_params=pltpu.CompilerParams(
            dimension_semantics=("parallel", "parallel", "arbitrary"),
            vmem_limit_bytes=32 * 1024 * 1024),
    )(qt, kk, vv, x_pad, gamma2d)

    return out_pad[:, :n, :].reshape(b, n, h, w_dim)


# -----------------------------------------------------------------------------
# Pure-JAX reference mirroring the PyTorch forward (f32 throughout).
# -----------------------------------------------------------------------------
def attention_layer_ref(x, w, bias, gamma, *, n, m):
    b, c, h, w_dim = x.shape
    L = h * w_dim
    xr = jnp.maximum(x.reshape(b, c, L), 0.0)
    qkv = jnp.einsum("oc,bcl->bol", w, xr) + bias[None, :, None]
    q, k, v = qkv[:, :m], qkv[:, m:2 * m], qkv[:, 2 * m:]
    beta = jnp.einsum("bdi,bdj->bij", q, k) / np.sqrt(m)
    beta = jax.nn.softmax(beta, axis=1)
    o = jnp.einsum("bci,bij->bcj", v, beta)
    return x + gamma[0] * o.reshape(b, c, h, w_dim)


if __name__ == "__main__":
    # Small deterministic setup: n (= channels) = 4, m = 8, b = 2, h = w = 16.
    n, m = 4, 8
    b, h, w_dim = 2, 16, 16

    key = jax.random.PRNGKey(0)
    kx, kw, kb = jax.random.split(key, 3)
    x = jax.random.normal(kx, (b, n, h, w_dim), dtype=jnp.float32)
    # Conv1d(n, 2m+n, 1) weight is (2m+n, n, 1) in torch; kernel_size=1 -> (2m+n, n).
    w = jax.random.normal(kw, (2 * m + n, n), dtype=jnp.float32) * 0.1
    bias = jax.random.normal(kb, (2 * m + n,), dtype=jnp.float32) * 0.1
    gamma = jnp.array([1.0], dtype=jnp.float32)

    out = attention_layer(x, w, bias, gamma, n=n, m=m)
    jax.block_until_ready(out)

    ref = attention_layer_ref(x, w, bias, gamma, n=n, m=m)
    # bf16 matmul operands + approx EUP reciprocal in the softmax normalization
    # => compare at bf16-level tolerance (softmax stats/accumulator stay f32).
    np.testing.assert_allclose(np.asarray(out), np.asarray(ref),
                               rtol=2e-2, atol=2e-2)

    print("KERNEL_OK")
</pallas_src>

<mosaic_0001>
module attributes {stable_mosaic.version = 11 : i64} {
  func.func @_qkv_kernel(%arg0: i32, %arg1: i32, %arg2: memref<1x16x256xf32, #tpu.memory_space<vmem>>, %arg3: memref<16x16xf32, #tpu.memory_space<vmem>>, %arg4: memref<16x16xf32, #tpu.memory_space<vmem>>, %arg5: memref<16x16xf32, #tpu.memory_space<vmem>>, %arg6: memref<16x1xf32, #tpu.memory_space<vmem>>, %arg7: memref<16x1xf32, #tpu.memory_space<vmem>>, %arg8: memref<16x1xf32, #tpu.memory_space<vmem>>, %arg9: memref<1x256x16xbf16, #tpu.memory_space<vmem>>, %arg10: memref<1x16x256xbf16, #tpu.memory_space<vmem>>, %arg11: memref<1x16x256xbf16, #tpu.memory_space<vmem>>) attributes {dimension_semantics = [#tpu.dimension_semantics<parallel>, #tpu.dimension_semantics<parallel>], iteration_bounds = array<i64: 2, 1>, scalar_prefetch = 0 : i64, scratch_operands = 0 : i64, tpu.core_type = #tpu.core_type<tc>, window_params = [{transform_indices = @transform_0, window_bounds = array<i64: 1, 16, 256>}, {pipeline_mode = #tpu.pipeline_mode<synchronous>, transform_indices = @transform_1, window_bounds = array<i64: 16, 16>}, {pipeline_mode = #tpu.pipeline_mode<synchronous>, transform_indices = @transform_2, window_bounds = array<i64: 16, 16>}, {pipeline_mode = #tpu.pipeline_mode<synchronous>, transform_indices = @transform_3, window_bounds = array<i64: 16, 16>}, {pipeline_mode = #tpu.pipeline_mode<synchronous>, transform_indices = @transform_4, window_bounds = array<i64: 16, 1>}, {pipeline_mode = #tpu.pipeline_mode<synchronous>, transform_indices = @transform_5, window_bounds = array<i64: 16, 1>}, {pipeline_mode = #tpu.pipeline_mode<synchronous>, transform_indices = @transform_6, window_bounds = array<i64: 16, 1>}, {transform_indices = @transform_7, window_bounds = array<i64: 1, 256, 16>}, {transform_indices = @transform_8, window_bounds = array<i64: 1, 16, 256>}, {transform_indices = @transform_9, window_bounds = array<i64: 1, 16, 256>}]} {
    %c0 = arith.constant 0 : index
    %c0_0 = arith.constant 0 : index
    %c0_1 = arith.constant 0 : index
    %0 = vector.load %arg2[%c0, %c0_0, %c0_1] : memref<1x16x256xf32, #tpu.memory_space<vmem>>, vector<1x16x256xf32>
    %1 = vector.shape_cast %0 : vector<1x16x256xf32> to vector<16x256xf32>
    %cst = arith.constant 0.000000e+00 : f32
    %2 = vector.broadcast %cst : f32 to vector<16x256xf32>
    %3 = arith.maximumf %1, %2 : vector<16x256xf32>
    %c0_2 = arith.constant 0 : index
    %c0_3 = arith.constant 0 : index
    %4 = vector.load %arg3[%c0_2, %c0_3] : memref<16x16xf32, #tpu.memory_space<vmem>>, vector<16x16xf32>
    %cst_4 = arith.constant dense<0.000000e+00> : vector<16x256xf32>
    %5 = tpu.matmul %4, %3, %cst_4 {dimension_numbers = #tpu.dot_dimension_numbers<[1], [0], [0], [1], [0, 0, 1, 1], [], []>} : vector<16x16xf32>, vector<16x256xf32>, vector<16x256xf32> -> vector<16x256xf32>
    %c0_5 = arith.constant 0 : index
    %c0_6 = arith.constant 0 : index
    %6 = vector.load %arg6[%c0_5, %c0_6] : memref<16x1xf32, #tpu.memory_space<vmem>>, vector<16x1xf32>
    %7 = vector.broadcast %6 : vector<16x1xf32> to vector<16x256xf32>
    %8 = arith.addf %5, %7 : vector<16x256xf32>
    %c0_7 = arith.constant 0 : index
    %c0_8 = arith.constant 0 : index
    %9 = vector.load %arg4[%c0_7, %c0_8] : memref<16x16xf32, #tpu.memory_space<vmem>>, vector<16x16xf32>
    %cst_9 = arith.constant dense<0.000000e+00> : vector<16x256xf32>
    %10 = tpu.matmul %9, %3, %cst_9 {dimension_numbers = #tpu.dot_dimension_numbers<[1], [0], [0], [1], [0, 0, 1, 1], [], []>} : vector<16x16xf32>, vector<16x256xf32>, vector<16x256xf32> -> vector<16x256xf32>
    %c0_10 = arith.constant 0 : index
    %c0_11 = arith.constant 0 : index
    %11 = vector.load %arg7[%c0_10, %c0_11] : memref<16x1xf32, #tpu.memory_space<vmem>>, vector<16x1xf32>
    %12 = vector.broadcast %11 : vector<16x1xf32> to vector<16x256xf32>
    %13 = arith.addf %10, %12 : vector<16x256xf32>
    %c0_12 = arith.constant 0 : index
    %c0_13 = arith.constant 0 : index
    %14 = vector.load %arg5[%c0_12, %c0_13] : memref<16x16xf32, #tpu.memory_space<vmem>>, vector<16x16xf32>
    %cst_14 = arith.constant dense<0.000000e+00> : vector<16x256xf32>
    %15 = tpu.matmul %14, %3, %cst_14 {dimension_numbers = #tpu.dot_dimension_numbers<[1], [0], [0], [1], [0, 0, 1, 1], [], []>} : vector<16x16xf32>, vector<16x256xf32>, vector<16x256xf32> -> vector<16x256xf32>
    %c0_15 = arith.constant 0 : index
    %c0_16 = arith.constant 0 : index
    %16 = vector.load %arg8[%c0_15, %c0_16] : memref<16x1xf32, #tpu.memory_space<vmem>>, vector<16x1xf32>
    %17 = vector.broadcast %16 : vector<16x1xf32> to vector<16x256xf32>
    %18 = arith.addf %15, %17 : vector<16x256xf32>
    %19 = tpu.transpose %8, [1, 0] : vector<16x256xf32> -> vector<256x16xf32>
    %20 = arith.truncf %19 : vector<256x16xf32> to vector<256x16xbf16>
    %c0_17 = arith.constant 0 : index
    %c0_18 = arith.constant 0 : index
    %c0_19 = arith.constant 0 : index
    %21 = vector.load %arg9[%c0_17, %c0_18, %c0_19] : memref<1x256x16xbf16, #tpu.memory_space<vmem>>, vector<1x256x16xbf16>
    %22 = vector.shape_cast %21 : vector<1x256x16xbf16> to vector<256x16xbf16>
    %23 = vector.shape_cast %20 : vector<256x16xbf16> to vector<1x256x16xbf16>
    tpu.vector_store %arg9[%c0_17, %c0_18, %c0_19], %23 {strides = array<i32>} : memref<1x256x16xbf16, #tpu.memory_space<vmem>>, vector<1x256x16xbf16>,
    %24 = arith.truncf %13 : vector<16x256xf32> to vector<16x256xbf16>
    %c0_20 = arith.constant 0 : index
    %c0_21 = arith.constant 0 : index
    %c0_22 = arith.constant 0 : index
    %25 = vector.load %arg10[%c0_20, %c0_21, %c0_22] : memref<1x16x256xbf16, #tpu.memory_space<vmem>>, vector<1x16x256xbf16>
    %26 = vector.shape_cast %25 : vector<1x16x256xbf16> to vector<16x256xbf16>
    %27 = vector.shape_cast %24 : vector<16x256xbf16> to vector<1x16x256xbf16>
    tpu.vector_store %arg10[%c0_20, %c0_21, %c0_22], %27 {strides = array<i32>} : memref<1x16x256xbf16, #tpu.memory_space<vmem>>, vector<1x16x256xbf16>,
    %28 = arith.truncf %18 : vector<16x256xf32> to vector<16x256xbf16>
    %c0_23 = arith.constant 0 : index
    %c0_24 = arith.constant 0 : index
    %c0_25 = arith.constant 0 : index
    %29 = vector.load %arg11[%c0_23, %c0_24, %c0_25] : memref<1x16x256xbf16, #tpu.memory_space<vmem>>, vector<1x16x256xbf16>
    %30 = vector.shape_cast %29 : vector<1x16x256xbf16> to vector<16x256xbf16>
    %31 = vector.shape_cast %28 : vector<16x256xbf16> to vector<1x16x256xbf16>
    tpu.vector_store %arg11[%c0_23, %c0_24, %c0_25], %31 {strides = array<i32>} : memref<1x16x256xbf16, #tpu.memory_space<vmem>>, vector<1x16x256xbf16>,
    return
  }
  func.func @transform_0(%arg0: i32, %arg1: i32) -> (i32, i32, i32) {
    %c0_i32 = arith.constant 0 : i32
    %c0_i32_0 = arith.constant 0 : i32
    return %arg0, %c0_i32, %arg1 : i32, i32, i32
  }
  func.func @transform_1(%arg0: i32, %arg1: i32) -> (i32, i32) {
    %c0_i32 = arith.constant 0 : i32
    %c0_i32_0 = arith.constant 0 : i32
    %c0_i32_1 = arith.constant 0 : i32
    return %c0_i32, %c0_i32_0 : i32, i32
  }
  func.func @transform_2(%arg0: i32, %arg1: i32) -> (i32, i32) {
    %c0_i32 = arith.constant 0 : i32
    %c0_i32_0 = arith.constant 0 : i32
    %c0_i32_1 = arith.constant 0 : i32
    return %c0_i32, %c0_i32_0 : i32, i32
  }
  func.func @transform_3(%arg0: i32, %arg1: i32) -> (i32, i32) {
    %c0_i32 = arith.constant 0 : i32
    %c0_i32_0 = arith.constant 0 : i32
    %c0_i32_1 = arith.constant 0 : i32
    return %c0_i32, %c0_i32_0 : i32, i32
  }
  func.func @transform_4(%arg0: i32, %arg1: i32) -> (i32, i32) {
    %c0_i32 = arith.constant 0 : i32
    %c0_i32_0 = arith.constant 0 : i32
    %c0_i32_1 = arith.constant 0 : i32
    return %c0_i32, %c0_i32_0 : i32, i32
  }
  func.func @transform_5(%arg0: i32, %arg1: i32) -> (i32, i32) {
    %c0_i32 = arith.constant 0 : i32
    %c0_i32_0 = arith.constant 0 : i32
    %c0_i32_1 = arith.constant 0 : i32
    return %c0_i32, %c0_i32_0 : i32, i32
  }
  func.func @transform_6(%arg0: i32, %arg1: i32) -> (i32, i32) {
    %c0_i32 = arith.constant 0 : i32
    %c0_i32_0 = arith.constant 0 : i32
    %c0_i32_1 = arith.constant 0 : i32
    return %c0_i32, %c0_i32_0 : i32, i32
  }
  func.func @transform_7(%arg0: i32, %arg1: i32) -> (i32, i32, i32) {
    %c0_i32 = arith.constant 0 : i32
    %c0_i32_0 = arith.constant 0 : i32
    return %arg0, %arg1, %c0_i32 : i32, i32, i32
  }
  func.func @transform_8(%arg0: i32, %arg1: i32) -> (i32, i32, i32) {
    %c0_i32 = arith.constant 0 : i32
    %c0_i32_0 = arith.constant 0 : i32
    return %arg0, %c0_i32, %arg1 : i32, i32, i32
  }
  func.func @transform_9(%arg0: i32, %arg1: i32) -> (i32, i32, i32) {
    %c0_i32 = arith.constant 0 : i32
    %c0_i32_0 = arith.constant 0 : i32
    return %arg0, %c0_i32, %arg1 : i32, i32, i32
  }
}

</mosaic_0001>

<bundles_post_ra>
// kernel: tpu_custom_call.1
= control target key start
LH: loop header
LB: loop body
LE: loop exit
PB: predicated region body
PF: predicated region fallthrough
CT: control target
= control target key end

     0   :  { %s1983_s0 = inlined_call_operand.hbm [shape: f32[2,16,256], index: 0, kind: input, shape index: {}]   ;;  %s1984_s1 = inlined_call_operand.vmem [shape: f32[16,16], index: 1, kind: input, shape index: {}]   ;;  %s1985_s2 = inlined_call_operand.vmem [shape: f32[16,16], index: 2, kind: input, shape index: {}]   ;;  %s1986_s3 = inlined_call_operand.vmem [shape: f32[16,16], index: 3, kind: input, shape index: {}]   ;;  %s1987_s4 = inlined_call_operand.vmem [shape: f32[16,1], index: 4, kind: input, shape index: {}]   ;;  %s1988_s5 = inlined_call_operand.vmem [shape: f32[16,1], index: 5, kind: input, shape index: {}]   ;;  %s1989_s6 = inlined_call_operand.vmem [shape: f32[16,1], index: 6, kind: input, shape index: {}]   ;;  %s1990_s7 = inlined_call_operand.vmem [shape: bf16[2,256,16], index: 7, kind: output, shape index: {0}]   ;;  %s1991_s8 = inlined_call_operand.hbm [shape: bf16[2,16,256], index: 8, kind: output, shape index: {1}]   ;;  %s1992_s9 = inlined_call_operand.hbm [shape: bf16[2,16,256], index: 9, kind: output, shape index: {2}]  }
   0x1   :  { %1996 = sst [smem:[#allocation12_spill]] %s1983_s0 }
   0x2   :  { %1997 = sst [smem:[#allocation13_spill]] %s1984_s1 }
   0x3   :  { %1998 = sst [smem:[#allocation14_spill]] %s1985_s2 }
   0x4   :  { %1999 = sst [smem:[#allocation15_spill]] %s1986_s3 }
   0x5   :  { %15 = vsyncpa [#allocation3], 0 }
   0x6   :  { %17 = vsyncpa [#allocation3 + $0x1], 0 }
   0x7   :  { %18 = vsyncpa [#allocation4], 0 }
   0x8   :  { %20 = vsyncpa [#allocation4 + $0x1], 0 }
   0x9   :  { %21 = vsyncpa [#allocation7], 0 }
   0xa   :  { %23 = vsyncpa [#allocation7 + $0x1], 0  ;;  %s1653_s30 = smov 0   ;;  %s1655_s10 = smov 0  }
   0xb   :  { %s1657_s11 = smov 0   ;;  %s1659_s12 = smov 0  }
   0xc   :  { %s1661_s13 = smov 0   ;;  %s1663_s14 = smov 0  }
   0xd LB: > { %s1172_s15 = sadd.s32 4294967295, %s1592_s14   ;;  %s1173_s16 = sadd.s32 4294967294, %s1592_s14   ;;  %s1592_s14 = sphi %s1663_s14, %s29_s14   ;;  %s1588_s13 = sphi %s1661_s13, %s2021_s13   ;;  %s1584_s12 = sphi %s1659_s12, %s2020_s12   ;;  %s1580_s11 = sphi %s1657_s11, %s2019_s11   ;;  %s1576_s10 = sphi %s1655_s10, %s2018_s10   ;;  %s1572_s30 = sphi %s1653_s30, %s2017_s30  }
   0xe   : > { %s41_s17 = sadd.s32 1, %s1588_s13  ;;  %s50_s18 = sadd.s32 1, %s1580_s11 }
   0xf   : > { %p43_p0 = scmp.ge.s32.totalorder %s41_s17, 2  ;;  %p57_p1 = scmp.ne.s32.totalorder %s1580_s11, %s1576_s10 }
  0x10   : > { %p58_p2 = scmp.eq.s32.totalorder %s1592_s14, 0  ;;  %p63_p3 = scmp.ne.s32.totalorder %s1576_s10, %s1572_s30 }
  0x11   : > { %s2023_s17 = smov (%p43_p0, %s41_s17), 0  ;;  %p64_p5 = scmp.eq.s32.totalorder %s1172_s15, 0 }
  0x12   : > { %2000 = sst [smem:[#allocation11_spill]] %s2023_s17  ;;  %p1694_p4 = por %p58_p2, %p57_p1 }
  0x13   : > { %s45_s20 = ssub.s32 %s1588_s13, %s2023_s17  ;;  %p243_p6 = scmp.eq.s32.totalorder %s1172_s15, 1 }
  0x14   : > { %p48_p7 = scmp.eq.s32.totalorder %s45_s20, 0  ;;  %p1700_p8 = por %p64_p5, %p63_p3 }
  0x15   : > { %p1704_p9 = por %p243_p6, %p57_p1  ;;  %p249_p10 = scmp.eq.s32.totalorder %s1173_s16, 1 }
  0x16   : > { %s1709_s23 = scalar_select %p48_p7, %s1580_s11, %s50_s18  }
  0x17   : > { %s2003_s22 = scalar_select %p1704_p9, 1, 0 }
  0x18   : > { %p1711_p11 = por %p249_p10, %p63_p3  ;;  %p1306_p13 = scmp.lt.s32.totalorder %s1592_s14, 2 }
  0x19   : > { %s315_s25 = sand.u32 1, %s1580_s11   ;;  %s1235_s27 = sshll.u32 %s1588_s13, 9 }
  0x1a   : > { %s2004_s24 = scalar_select %p1711_p11, 1, 0 }
  0x1b   : > { %s1176_s26 = sshll.u32 %s315_s25, 5  ;;  %s2005_s0 = sld [smem:[#allocation12_spill]] }
  0x1c   : > { %s319_s16 = scalar_lea.vmem [#allocation2], %s1176_s26  ;;  %p1728_p0 = pnand %p1306_p13, %p1694_p4 }
  0x1d   : > { %s328_s18 = sshll.u32 %s319_s16, 4  ;;  %s1733_s17 = scalar_lea.sflag [#allocation3], %s315_s25  ;;  %s1724_s18 = int_to_ptr.vmem [resolvable:$true] %s328_s18 }
  0x1e   : > { %p1450_p3 = pneg %p1728_p0 }
  0x21   : > { %s1722_s15 = scalar_lea.hbm %s2005_s0, %s1235_s27  ;;  %s1453_s19 = scalar_lea.hbm %s2005_s0, 1024 }
  0x22   : > { %s1448_s27 = scalar_lea.hbm %s1722_s15, 512  ;;  %p1454_p4 = scmp.lt.u32.totalorder %s1722_s15, %s2005_s0 }
  0x23   : > { %p1449_p2 = scmp.ne.s32.totalorder %s1722_s15, %s1448_s27  ;;  %p1455_p7 = scmp.lt.u32.totalorder %s1453_s19, %s1448_s27 }
  0x24   : > { %p1457_p13 = scmp.lt.u32.totalorder %s1448_s27, %s1722_s15 }
  0x25   : > { %p1451_p5 = pnand %p1450_p3, %p1449_p2  ;;  %p1456_p10 = por %p1455_p7, %p1454_p4 }
  0x27   : > { %p1452_p6 = pneg %p1451_p5  ;;  %p1458_p12 = por %p1457_p13, %p1456_p10 }
  0x29   : > { %p1459_p1 = pnand %p1458_p12, %p1452_p6 }
  0x2b   : > { %1462 = shalt.err (!%p1459_p1)
}
  0x2c   : > { %s1463_s25 = scalar_lea.vmem %s1724_s18, 512  ;;  %s1594_s26 = smov [#allocation2]  }
  0x2d   : > { %p1464_p2 = scmp.ne.s32.totalorder %s1724_s18, %s1463_s25  ;;  %s1468_s28 = sshll.u32 %s1594_s26, 4  ;;  %s1469_s28 = int_to_ptr.vmem [resolvable:$false] %s1468_s28 }
  0x2e   : > { %s1470_s29 = scalar_lea.vmem %s1469_s28, 1024  ;;  %p1471_p9 = scmp.lt.s32.totalorder %s1724_s18, %s1469_s28 }
  0x2f   : > { %p1466_p5 = pnand %p1464_p2, %p1450_p3  ;;  %p1472_p4 = scmp.lt.s32.totalorder %s1470_s29, %s1463_s25 }
  0x31   : > { %p1467_p11 = pneg %p1466_p5  ;;  %p1473_p7 = por %p1472_p4, %p1471_p9 }
  0x33   : > { %p1474_p10 = pnand %p1473_p7, %p1467_p11 }
  0x35   : > { %1477 = shalt.err (!%p1474_p10)
}
  0x36   : > { %s1595_s27 = smov 256   ;;  %s1596_s19 = smov 16  }
  0x37   : > { %1298 = dma.hbm_to_vmem [thread:$0]  (!%p1728_p0), %s1722_s15, 512, %s1724_s18, %s1733_s17, %s1595_s27, %s1595_s27, %s1596_s19  }
  0x38   : > { %p336_p12 = scmp.lt.s32.totalorder %s1592_s14, 3  ;;  %p2007_p1 = scmp.ge.s32.totalorder %s1592_s14, 1 }
  0x3a   : > { %p337_p3 = pnand %p2007_p1, %p336_p12 }
  0x3b   : > { %s1765_s16 = sand.u32 (!%p337_p3), 1, %s1576_s10  }
  0x3c   : > { %340 = sbr.rel (%p337_p3) target bundleno = 488 (0x1e8), region = 48  ;;  %s1180_s25 = sshll.u32 (!%p337_p3), %s1765_s16, 5 }
  0x3d   : > { %s343_s26 = scalar_lea.sflag (!%p337_p3), [#allocation3], %s1765_s16  ;;  %s346_s28 = scalar_lea.vmem (!%p337_p3), [#allocation2], %s1180_s25 }
  0x43   : > { %1559 = dma.done.wait (%p1700_p8), %s343_s26, 512  }
  0x44   : > { %1561 = vsyncadd (%p1700_p8), %s343_s26, 4294966784  ;;  %v1597_v0 = vmov 0.0   ;;  %v1598_v1 = vmov 0   ;;  %v409_v2 = vld [vmem:[%s346_s28 + $0x8] sm:$0xff]  ;;  %v411_v3 = vld [vmem:[%s346_s28 + $0x18] sm:$0xff]  ;;  %s2008_s1 = sld [smem:[#allocation13_spill]] }
  0x45   : > { %501 = vmatprep.mubr.f32.mxu0 %v1597_v0  ;;  %507 = vmatprep.mubr.f32.mxu1 %v1597_v0  ;;  %v408_v4 = vld [vmem:[%s346_s28] sm:$0xff]  ;;  %v413_v5 = vmax.f32 %v409_v2, 0.0  ;;  %v415_v6 = vmax.f32 %v411_v3, 0.0  ;;  %v410_v7 = vld [vmem:[%s346_s28 + $0x10] sm:$0xff]  ;;  %v419_v13 = vld [vmem:[%s1987_s4 + $0x8] sm:$0xff]  ;;  %vm430_vm0 = vcmask 130048  }
  0x46   : > { %1362 = vset.pattern.permute.xlu0 %v1598_v1  ;;  %1363 = vset.pattern.permute.xlu1 %v1598_v1  ;;  %v412_v8 = vmax.f32 %v408_v4, 0.0  ;;  %v414_v9 = vmax.f32 %v410_v7, 0.0  ;;  %v418_v10 = vld [vmem:[%s1987_s4] sm:$0xff]  ;;  %s2009_s3 = sld [smem:[#allocation15_spill]]  ;;  %s2010_s2 = sld [smem:[#allocation14_spill]]  ;;  %v517_v22 = vld [vmem:[%s1988_s5 + $0x8] sm:$0xff] }
  0x47   : > { %v1275_v11 = vpack.c.bf16 %v415_v6, %v413_v5  ;;  %422 = vperm.xlu0 %1362, %v418_v10   ;;  %v613_v16 = vld [vmem:[%s1989_s6] sm:$0xff]  ;;  %v614_v23 = vld [vmem:[%s1989_s6 + $0x8] sm:$0xff]  ;;  %s1181_s21 = sshll.u32 %s1765_s16, 4  ;;  %s1995_s19 = sshll.u32 %s1584_s12, 8 }
  0x48   : > { %v1277_v12 = vpack.c.bf16 %v414_v9, %v412_v8  ;;  %v516_v21 = vld [vmem:[%s1988_s5] sm:$0xff]  ;;  %s394_s18 = scalar_lea.vmem [#allocation6], %s1181_s21  ;;  %s387_s20 = scalar_lea.vmem [#allocation5], %s1181_s21 }
  0x49   : > { %1276 = vmatprep.subr.bf16.mxu0 %v1275_v11  ;;  %1287 = vmatprep.subr.bf16.mxu1 %v1275_v11  ;;  %s1013_s29 = sshll.u32 %s394_s18, 4  ;;  %s995_s27 = sshll.u32 %s387_s20, 4  ;;  %s1816_s29 = int_to_ptr.vmem [resolvable:$true] %s1013_s29  ;;  %s1818_s27 = int_to_ptr.vmem [resolvable:$true] %s995_s27 }
  0x4a   : > { %1278 = vmatpush1.bf16.msra.mxu0 %v1277_v12  ;;  %1288 = vmatpush1.bf16.msra.mxu1 %v1277_v12  ;;  %v416_v14 = vld [vmem:[%s2008_s1] sm:$0xff]  ;;  %v417_v15 = vld [vmem:[%s2008_s1 + $0x8] sm:$0xff]  ;;  %s1826_s28 = scalar_lea.hbm %s1991_s8, %s1995_s19  ;;  %s1478_s15 = scalar_lea.vmem %s1818_s27, 256 }
  0x4b   : > { %1284 = vmatprep.subr.bf16.mxu0 %v1275_v11  ;;  %427 = vperm.xlu0 %1362, %v419_v13   ;;  %p1479_p8 = scmp.ne.s32.totalorder %s1818_s27, %s1478_s15  ;;  %p2011_p9 = scmp.ne.s32.totalorder %s2003_s22, 0 }
  0x4c   : > { %1280 = vmatprep.subr.bf16.mxu1 %v1275_v11  ;;  %v611_v17 = vld [vmem:[%s2009_s3] sm:$0xff]  ;;  %v612_v19 = vld [vmem:[%s2009_s3 + $0x8] sm:$0xff]  ;;  %520 = vperm.xlu1 %1363, %v516_v21   ;;  %s1599_s21 = smov [#allocation5]  }
  0x4d   : > { %1185 = vmatmul.mubr.msk.f32.vlgmr.msra.gmra.mrb[0].mxu0 %vm430_vm0, %v416_v14  ;;  %1186 = vmatmul.mubr.msk.f32.vlgmr.msra.gmra.mrb[0].mxu1 %vm430_vm0, %v417_v15  ;;  %v514_v18 = vld [vmem:[%s2010_s2] sm:$0xff]  ;;  %v515_v20 = vld [vmem:[%s2010_s2 + $0x8] sm:$0xff]  ;;  %p1480_p11 = pnand %p1479_p8, %p2011_p9 }
  0x4e   : > { %1286 = vmatpush1.bf16.msra.mxu0 %v1277_v12  ;;  %695 = vmatprep.mubr.f32.mxu0 %v1597_v0 }
  0x4f   : > { %617 = vperm.xlu0 %1362, %v613_v16   ;;  %1282 = vmatpush1.bf16.msra.mxu1 %v1277_v12  ;;  %p1481_p0 = pneg %p1480_p11 }
  0x50   : > { %598 = vmatprep.mubr.f32.mxu1 %v1597_v0  ;;  %525 = vperm.xlu1 %1363, %v517_v22  }
  0x51   : > { %1189 = vmatmul.mubr.msk.f32.vlgmr.msra.gmra.mrb[2].mxu0 %vm430_vm0, %v611_v17 }
  0x52   : > { %1187 = vmatmul.mubr.msk.f32.vlgmr.msra.gmra.mrb[2].mxu1 %vm430_vm0, %v514_v18  ;;  %701 = vmatprep.mubr.f32.mxu0 %v1597_v0 }
  0x53   : > { %604 = vmatprep.mubr.f32.mxu1 %v1597_v0 }
  0x54   : > { %622 = vperm.xlu1 %1363, %v614_v23  }
  0x55   : > { %1190 = vmatmul.mubr.msk.f32.gmra.mrb[4].mxu0 %vm430_vm0, %v612_v19 }
  0x56   : > { %1188 = vmatmul.mubr.msk.f32.gmra.mrb[4].mxu1 %vm430_vm0, %v515_v20 }
  0xc6   : > { %v423_v24 = vpop.permute.xlu0 %422 }
  0xca   : > { %v428_v25 = vpop.permute.xlu0 %427 }
  0xcb   : > { %v521_v42 = vpop.permute.xlu1 %520 }
  0xce   : > { %v618_v34 = vpop.permute.xlu0 %617 }
  0xcf   : > { %v526_v43 = vpop.permute.xlu1 %525 }
  0xd3   : > { %v623_v49 = vpop.permute.xlu1 %622 }
 0x120   : > { %v503_v26 = vpop.f32.mrb[0].mxu0  ;;  %v509_v27 = vpop.f32.mrb[0].mxu1 }
 0x121   : > { %v504_v28 = vadd.f32 %v503_v26, %v423_v24  ;;  %v510_v29 = vadd.f32 %v509_v27, %v428_v25  ;;  %v505_v30 = vpop.f32.mrb[1].mxu0  ;;  %v511_v31 = vpop.f32.mrb[1].mxu1 }
 0x122   : > { %v506_v32 = vadd.f32 %v505_v30, %v423_v24  ;;  %v512_v33 = vadd.f32 %v511_v31, %v428_v25 }
 0x124   : > { %v1364_v35 = vpack.i.bf16 %v506_v32, %v504_v28  ;;  %v1366_v36 = vpack.i.bf16 %v512_v33, %v510_v29  ;;  %v697_v37 = vpop.f32.mrb[2].mxu0 }
 0x125   : > { %v698_v38 = vadd.f32 %v697_v37, %v618_v34  ;;  %v699_v39 = vpop.f32.mrb[3].mxu0  ;;  %v600_v44 = vpop.f32.mrb[2].mxu1 }
 0x126   : > { %v700_v40 = vadd.f32 %v699_v39, %v618_v34  ;;  %1365 = vxpose.xlu0.b32.start [1/2] (short) %v1364_v35, 128  ;;  %v602_v45 = vpop.f32.mrb[3].mxu1  ;;  %v601_v46 = vadd.f32 %v600_v44, %v521_v42 }
 0x127   : > { %v603_v51 = vadd.f32 %v602_v45, %v521_v42 }
 0x128   : > { %v1271_v41 = vpack.c.bf16 %v700_v40, %v698_v38  ;;  %v703_v48 = vpop.f32.mrb[4].mxu0 }
 0x129   : > { %v606_v47 = vpop.f32.mrb[4].mxu1  ;;  %v704_v53 = vadd.f32 %v703_v48, %v623_v49  ;;  %v705_v55 = vpop.f32.mrb[5].mxu0  ;;  %v1269_v57 = vpack.c.bf16 %v603_v51, %v601_v46 }
 0x12a   : > { %959 = vst [vmem:[%s394_s18] sm:$0xff] %v1271_v41  ;;  %1367 = vxpose.xlu0.b32.end [2/2] (short) %v1366_v36, 128  ;;  %v608_v50 = vpop.f32.mrb[5].mxu1  ;;  %v607_v52 = vadd.f32 %v606_v47, %v526_v43  ;;  %v706_v56 = vadd.f32 %v705_v55, %v623_v49 }
 0x12b   : > { %v609_v54 = vadd.f32 %v608_v50, %v526_v43  ;;  %945 = vst [vmem:[%s387_s20] sm:$0xff] %v1269_v57 }
 0x12c   : > { %v1272_v59 = vpack.c.bf16 %v706_v56, %v704_v53 }
 0x12d   : > { %v1270_v58 = vpack.c.bf16 %v609_v54, %v607_v52 }
 0x12e   : > { %960 = vst [vmem:[%s394_s18 + $0x8] sm:$0xff] %v1272_v59  ;;  %s1482_s18 = sshll.u32 %s1599_s21, 4  ;;  %s1483_s18 = int_to_ptr.vmem [resolvable:$false] %s1482_s18 }
 0x12f   : > { %946 = vst [vmem:[%s387_s20 + $0x8] sm:$0xff] %v1270_v58  ;;  %s1484_s20 = scalar_lea.vmem %s1483_s18, 512  ;;  %p1485_p6 = scmp.lt.s32.totalorder %s1818_s27, %s1483_s18 }
 0x130   : > { %p1486_p13 = scmp.lt.s32.totalorder %s1484_s20, %s1478_s15 }
 0x132   : > { %p1487_p2 = por %p1486_p13, %p1485_p6 }
 0x134   : > { %p1488_p5 = pnand %p1487_p2, %p1481_p0 }
 0x136   : > { %1491 = shalt.err (!%p1488_p5)
}
 0x137   : > { %s1492_s25 = scalar_lea.hbm %s1826_s28, 256  ;;  %s1496_s21 = scalar_lea.hbm %s1991_s8, 512 }
 0x138   : > { %p1493_p4 = scmp.ne.s32.totalorder %s1826_s28, %s1492_s25  ;;  %p1497_p12 = scmp.lt.u32.totalorder %s1826_s28, %s1991_s8 }
 0x139   : > { %p1498_p1 = scmp.lt.u32.totalorder %s1496_s21, %s1492_s25  ;;  %p1500_p8 = scmp.lt.u32.totalorder %s1492_s25, %s1826_s28 }
 0x13a   : > { %p1494_p7 = pnand %p1493_p4, %p2011_p9 }
 0x13b   : > { %p1499_p3 = por %p1498_p1, %p1497_p12 }
 0x13c   : > { %p1495_p10 = pneg %p1494_p7 }
 0x13d   : > { %p1501_p11 = por %p1500_p8, %p1499_p3 }
 0x13f   : > { %p1502_p0 = pnand %p1501_p11, %p1495_p10 }
 0x141   : > { %1505 = shalt.err (!%p1502_p0)
}
 0x142   : > { %s1600_s15 = smov 128   ;;  %s1601_s19 = smov 8  }
 0x143   : > { %s2012_s17 = scalar_lea.sflag [#allocation4], %s1765_s16  ;;  %s2013_s20 = sshll.u32 %s1584_s12, 8 }
 0x144   : > { %1291 = dma.vmem_to_hbm [thread:$0]  (%p2011_p9), %s1818_s27, 256, %s1826_s28, %s2012_s17, %s1600_s15, %s1600_s15, %s1601_s19  }
 0x145   : > { %s1860_s21 = scalar_lea.hbm %s1992_s9, %s2013_s20  ;;  %s976_s18 = scalar_lea.sflag [#allocation7], %s1765_s16 }
 0x146   : > { %s1506_s0 = scalar_lea.vmem %s1816_s29, 256  ;;  %s1602_s1 = smov [#allocation6]  }
 0x147   : > { %p1507_p6 = scmp.ne.s32.totalorder %s1816_s29, %s1506_s0  ;;  %s1510_s2 = sshll.u32 %s1602_s1, 4  ;;  %s1511_s2 = int_to_ptr.vmem [resolvable:$false] %s1510_s2 }
 0x148   : > { %s1512_s3 = scalar_lea.vmem %s1511_s2, 512  ;;  %p1513_p5 = scmp.lt.s32.totalorder %s1816_s29, %s1511_s2 }
 0x149   : > { %p1508_p13 = pnand %p1507_p6, %p2011_p9  ;;  %p1514_p4 = scmp.lt.s32.totalorder %s1512_s3, %s1506_s0 }
 0x14b   : > { %p1509_p2 = pneg %p1508_p13  ;;  %p1515_p7 = por %p1514_p4, %p1513_p5 }
 0x14d   : > { %p1516_p10 = pnand %p1515_p7, %p1509_p2 }
 0x14f   : > { %1519 = shalt.err (!%p1516_p10)
}
 0x150   : > { %s1520_s27 = scalar_lea.hbm %s1860_s21, 256  ;;  %s1524_s1 = scalar_lea.hbm %s1992_s9, 512 }
 0x151   : > { %p1521_p12 = scmp.ne.s32.totalorder %s1860_s21, %s1520_s27  ;;  %p1525_p8 = scmp.lt.u32.totalorder %s1860_s21, %s1992_s9 }
 0x152   : > { %p1526_p11 = scmp.lt.u32.totalorder %s1524_s1, %s1520_s27  ;;  %p1528_p6 = scmp.lt.u32.totalorder %s1520_s27, %s1860_s21 }
 0x153   : > { %p1522_p1 = pnand %p1521_p12, %p2011_p9 }
 0x154   : > { %p1527_p0 = por %p1526_p11, %p1525_p8 }
 0x155   : > { %p1523_p3 = pneg %p1522_p1 }
 0x156   : > { %p1529_p13 = por %p1528_p6, %p1527_p0 }
 0x158   : > { %p1530_p2 = pnand %p1529_p13, %p1523_p3 }
 0x15a   : > { %1533 = shalt.err (!%p1530_p2)
}
 0x15b   : > { %1292 = dma.vmem_to_hbm [thread:$0]  (%p2011_p9), %s1816_s29, 256, %s1860_s21, %s976_s18, %s1600_s15, %s1600_s15, %s1601_s19   ;;  %vm900_vm1 = vcmask 125952  }
 0x15c   : > { %p397_p5 = scmp.lt.s32.totalorder %s1584_s12, 1 }
 0x15e   : > { %s2025_s12 = smov (!%p397_p5, %s1584_s12), 1 }
 0x15f   : > { %s1236_s0 = sshll.u32 %s2025_s12, 7 }
 0x160   : > { %s1894_s22 = scalar_lea.vmem %s1990_s7, %s1236_s0 }
 0x1a6   : > { %v1368_v60 = vpop.trf.xlu0 }
 0x1a7   : > { %v1372_v61 = vunpack.i.h.bf16 %v1368_v60  ;;  %v1369_v62 = vunpack.i.l.bf16 %v1368_v60 }
 0x1a9   : > { %v1253_v63 = vpack.c.bf16 %v1372_v61, %v1372_v61  ;;  %v1237_v0 = vpack.c.bf16 %v1369_v62, %v1369_v62 }
 0x1aa   : > { %v1373_v1 = vpop.trf.xlu0 }
 0x1ab   : > { %917 = vst.msk [vmem:[%s1894_s22 + $0x40] sm:$0xf] %vm900_vm1, %v1253_v63  ;;  %901 = vst.msk [vmem:[%s1894_s22] sm:$0xf] %vm900_vm1, %v1237_v0  ;;  %v1377_v2 = vunpack.i.h.bf16 %v1373_v1  ;;  %v1374_v3 = vunpack.i.l.bf16 %v1373_v1 }
 0x1ad   : > { %v1254_v4 = vpack.c.bf16 %v1377_v2, %v1377_v2  ;;  %v1238_v5 = vpack.c.bf16 %v1374_v3, %v1374_v3 }
 0x1ae   : > { %v1378_v6 = vpop.trf.xlu0 }
 0x1af   : > { %918 = vst.msk [vmem:[%s1894_s22 + $0x44] sm:$0xf] %vm900_vm1, %v1254_v4  ;;  %902 = vst.msk [vmem:[%s1894_s22 + $0x4] sm:$0xf] %vm900_vm1, %v1238_v5  ;;  %v1382_v7 = vunpack.i.h.bf16 %v1378_v6  ;;  %v1379_v8 = vunpack.i.l.bf16 %v1378_v6 }
 0x1b1   : > { %v1255_v9 = vpack.c.bf16 %v1382_v7, %v1382_v7  ;;  %v1239_v10 = vpack.c.bf16 %v1379_v8, %v1379_v8 }
 0x1b2   : > { %v1383_v11 = vpop.trf.xlu0 }
 0x1b3   : > { %919 = vst.msk [vmem:[%s1894_s22 + $0x48] sm:$0xf] %vm900_vm1, %v1255_v9  ;;  %903 = vst.msk [vmem:[%s1894_s22 + $0x8] sm:$0xf] %vm900_vm1, %v1239_v10  ;;  %v1387_v12 = vunpack.i.h.bf16 %v1383_v11  ;;  %v1384_v13 = vunpack.i.l.bf16 %v1383_v11 }
 0x1b5   : > { %v1256_v14 = vpack.c.bf16 %v1387_v12, %v1387_v12  ;;  %v1240_v15 = vpack.c.bf16 %v1384_v13, %v1384_v13 }
 0x1b6   : > { %v1388_v16 = vpop.trf.xlu0 }
 0x1b7   : > { %920 = vst.msk [vmem:[%s1894_s22 + $0x4c] sm:$0xf] %vm900_vm1, %v1256_v14  ;;  %904 = vst.msk [vmem:[%s1894_s22 + $0xc] sm:$0xf] %vm900_vm1, %v1240_v15  ;;  %v1392_v17 = vunpack.i.h.bf16 %v1388_v16  ;;  %v1389_v18 = vunpack.i.l.bf16 %v1388_v16 }
 0x1b9   : > { %v1257_v19 = vpack.c.bf16 %v1392_v17, %v1392_v17  ;;  %v1241_v20 = vpack.c.bf16 %v1389_v18, %v1389_v18 }
 0x1ba   : > { %v1393_v21 = vpop.trf.xlu0 }
 0x1bb   : > { %921 = vst.msk [vmem:[%s1894_s22 + $0x50] sm:$0xf] %vm900_vm1, %v1257_v19  ;;  %905 = vst.msk [vmem:[%s1894_s22 + $0x10] sm:$0xf] %vm900_vm1, %v1241_v20  ;;  %v1397_v22 = vunpack.i.h.bf16 %v1393_v21  ;;  %v1394_v23 = vunpack.i.l.bf16 %v1393_v21 }
 0x1bd   : > { %v1258_v24 = vpack.c.bf16 %v1397_v22, %v1397_v22  ;;  %v1242_v25 = vpack.c.bf16 %v1394_v23, %v1394_v23 }
 0x1be   : > { %v1398_v26 = vpop.trf.xlu0 }
 0x1bf   : > { %922 = vst.msk [vmem:[%s1894_s22 + $0x54] sm:$0xf] %vm900_vm1, %v1258_v24  ;;  %906 = vst.msk [vmem:[%s1894_s22 + $0x14] sm:$0xf] %vm900_vm1, %v1242_v25  ;;  %v1402_v27 = vunpack.i.h.bf16 %v1398_v26  ;;  %v1399_v28 = vunpack.i.l.bf16 %v1398_v26 }
 0x1c1   : > { %v1259_v29 = vpack.c.bf16 %v1402_v27, %v1402_v27  ;;  %v1243_v30 = vpack.c.bf16 %v1399_v28, %v1399_v28 }
 0x1c2   : > { %v1403_v31 = vpop.trf.xlu0 }
 0x1c3   : > { %923 = vst.msk [vmem:[%s1894_s22 + $0x58] sm:$0xf] %vm900_vm1, %v1259_v29  ;;  %907 = vst.msk [vmem:[%s1894_s22 + $0x18] sm:$0xf] %vm900_vm1, %v1243_v30  ;;  %v1407_v32 = vunpack.i.h.bf16 %v1403_v31  ;;  %v1404_v33 = vunpack.i.l.bf16 %v1403_v31 }
 0x1c5   : > { %v1260_v34 = vpack.c.bf16 %v1407_v32, %v1407_v32  ;;  %v1244_v35 = vpack.c.bf16 %v1404_v33, %v1404_v33 }
 0x1c6   : > { %v1408_v36 = vpop.trf.xlu0 }
 0x1c7   : > { %924 = vst.msk [vmem:[%s1894_s22 + $0x5c] sm:$0xf] %vm900_vm1, %v1260_v34  ;;  %908 = vst.msk [vmem:[%s1894_s22 + $0x1c] sm:$0xf] %vm900_vm1, %v1244_v35  ;;  %v1412_v37 = vunpack.i.h.bf16 %v1408_v36  ;;  %v1409_v38 = vunpack.i.l.bf16 %v1408_v36 }
 0x1c9   : > { %v1261_v39 = vpack.c.bf16 %v1412_v37, %v1412_v37  ;;  %v1245_v40 = vpack.c.bf16 %v1409_v38, %v1409_v38 }
 0x1ca   : > { %v1413_v41 = vpop.trf.xlu0 }
 0x1cb   : > { %925 = vst.msk [vmem:[%s1894_s22 + $0x60] sm:$0xf] %vm900_vm1, %v1261_v39  ;;  %909 = vst.msk [vmem:[%s1894_s22 + $0x20] sm:$0xf] %vm900_vm1, %v1245_v40  ;;  %v1417_v42 = vunpack.i.h.bf16 %v1413_v41  ;;  %v1414_v43 = vunpack.i.l.bf16 %v1413_v41 }
 0x1cd   : > { %v1262_v44 = vpack.c.bf16 %v1417_v42, %v1417_v42  ;;  %v1246_v45 = vpack.c.bf16 %v1414_v43, %v1414_v43 }
 0x1ce   : > { %v1418_v46 = vpop.trf.xlu0 }
 0x1cf   : > { %926 = vst.msk [vmem:[%s1894_s22 + $0x64] sm:$0xf] %vm900_vm1, %v1262_v44  ;;  %910 = vst.msk [vmem:[%s1894_s22 + $0x24] sm:$0xf] %vm900_vm1, %v1246_v45  ;;  %v1422_v47 = vunpack.i.h.bf16 %v1418_v46  ;;  %v1419_v48 = vunpack.i.l.bf16 %v1418_v46 }
 0x1d1   : > { %v1263_v49 = vpack.c.bf16 %v1422_v47, %v1422_v47  ;;  %v1247_v50 = vpack.c.bf16 %v1419_v48, %v1419_v48 }
 0x1d2   : > { %v1423_v51 = vpop.trf.xlu0 }
 0x1d3   : > { %927 = vst.msk [vmem:[%s1894_s22 + $0x68] sm:$0xf] %vm900_vm1, %v1263_v49  ;;  %911 = vst.msk [vmem:[%s1894_s22 + $0x28] sm:$0xf] %vm900_vm1, %v1247_v50  ;;  %v1427_v52 = vunpack.i.h.bf16 %v1423_v51  ;;  %v1424_v53 = vunpack.i.l.bf16 %v1423_v51 }
 0x1d5   : > { %v1264_v54 = vpack.c.bf16 %v1427_v52, %v1427_v52  ;;  %v1248_v55 = vpack.c.bf16 %v1424_v53, %v1424_v53 }
 0x1d6   : > { %v1428_v56 = vpop.trf.xlu0 }
 0x1d7   : > { %928 = vst.msk [vmem:[%s1894_s22 + $0x6c] sm:$0xf] %vm900_vm1, %v1264_v54  ;;  %912 = vst.msk [vmem:[%s1894_s22 + $0x2c] sm:$0xf] %vm900_vm1, %v1248_v55  ;;  %v1432_v57 = vunpack.i.h.bf16 %v1428_v56  ;;  %v1429_v58 = vunpack.i.l.bf16 %v1428_v56 }
 0x1d9   : > { %v1265_v59 = vpack.c.bf16 %v1432_v57, %v1432_v57  ;;  %v1249_v60 = vpack.c.bf16 %v1429_v58, %v1429_v58 }
 0x1da   : > { %v1433_v61 = vpop.trf.xlu0 }
 0x1db   : > { %929 = vst.msk [vmem:[%s1894_s22 + $0x70] sm:$0xf] %vm900_vm1, %v1265_v59  ;;  %913 = vst.msk [vmem:[%s1894_s22 + $0x30] sm:$0xf] %vm900_vm1, %v1249_v60  ;;  %v1437_v62 = vunpack.i.h.bf16 %v1433_v61  ;;  %v1434_v63 = vunpack.i.l.bf16 %v1433_v61 }
 0x1dd   : > { %v1266_v0 = vpack.c.bf16 %v1437_v62, %v1437_v62  ;;  %v1250_v1 = vpack.c.bf16 %v1434_v63, %v1434_v63 }
 0x1de   : > { %v1438_v2 = vpop.trf.xlu0 }
 0x1df   : > { %930 = vst.msk [vmem:[%s1894_s22 + $0x74] sm:$0xf] %vm900_vm1, %v1266_v0  ;;  %914 = vst.msk [vmem:[%s1894_s22 + $0x34] sm:$0xf] %vm900_vm1, %v1250_v1  ;;  %v1442_v3 = vunpack.i.h.bf16 %v1438_v2  ;;  %v1439_v4 = vunpack.i.l.bf16 %v1438_v2 }
 0x1e1   : > { %v1267_v5 = vpack.c.bf16 %v1442_v3, %v1442_v3  ;;  %v1251_v6 = vpack.c.bf16 %v1439_v4, %v1439_v4 }
 0x1e2   : > { %v1443_v7 = vpop.trf.xlu0 }
 0x1e3   : > { %931 = vst.msk [vmem:[%s1894_s22 + $0x78] sm:$0xf] %vm900_vm1, %v1267_v5  ;;  %915 = vst.msk [vmem:[%s1894_s22 + $0x38] sm:$0xf] %vm900_vm1, %v1251_v6  ;;  %v1447_v8 = vunpack.i.h.bf16 %v1443_v7  ;;  %v1444_v9 = vunpack.i.l.bf16 %v1443_v7 }
 0x1e5   : > { %v1268_v10 = vpack.c.bf16 %v1447_v8, %v1447_v8  ;;  %v1252_v11 = vpack.c.bf16 %v1444_v9, %v1444_v9 }
 0x1e7   : > { %932 = vst.msk [vmem:[%s1894_s22 + $0x7c] sm:$0xf] %vm900_vm1, %v1268_v10  ;;  %916 = vst.msk [vmem:[%s1894_s22 + $0x3c] sm:$0xf] %vm900_vm1, %v1252_v11 }
 0x1e8 PF: > { %s1040_s12 = sand.u32 1, %s1572_s30   ;;  %p2014_p9 = scmp.ne.s32.totalorder %s2004_s24, 0 }
 0x1e9   : > { %p2015_p4 = scmp.ge.s32.totalorder %s1592_s14, 2  ;;  %s1041_s16 = scalar_lea.sflag [#allocation4], %s1040_s12 }
 0x1eb   : > { %p1300_p7 = pnand %p2015_p4, %p2014_p9 }
 0x1ed   : > { %1563 = dma.done.wait (!%p1300_p7), %s1041_s16, 256  }
 0x1ee   : > { %1565 = vsyncadd (!%p1300_p7), %s1041_s16, 4294967040  ;;  %s1050_s29 = scalar_lea.sflag [#allocation7], %s1040_s12 }
 0x1ef   : > { %1567 = dma.done.wait (!%p1300_p7), %s1050_s29, 256  }
 0x1f0   : > { %1569 = vsyncadd (!%p1300_p7), %s1050_s29, 4294967040  ;;  %s29_s14 = sadd.s32 1, %s1592_s14   ;;  %s2016_s15 = sld [smem:[#allocation11_spill]] }
 0x1f1   : > { %p26_p10 = scmp.ge.s32.totalorder %s29_s14, 4   ;;  %s2017_s30 = smov %s1576_s10 }
 0x1f2   : > { %s2018_s10 = smov %s1580_s11  ;;  %s2019_s11 = smov %s1709_s23 }
 0x1f3   : > { %s2020_s12 = smov %s1588_s13  ;;  %28 = sbr.rel (!%p26_p10) target bundleno = 13 (0xd), region = 122 }
 0x1f6   : > { %s2021_s13 = smov %s2016_s15 }
 0x1fa   :  { %1055 = vsyncpa [#allocation3], 1 }
 0x1fb   :  { %1057 = vsyncpa [#allocation3 + $0x1], 1 }
 0x1fc   :  { %1058 = vsyncpa [#allocation4], 1 }
 0x1fd   :  { %1060 = vsyncpa [#allocation4 + $0x1], 1 }
 0x1fe   :  { %1061 = vsyncpa [#allocation7], 1 }
 0x1ff   :  { %1063 = vsyncpa [#allocation7 + $0x1], 1 }

</bundles_post_ra>
